<compile_context>
chip_gen: v7x
topology: tpu7x:2x2x1
jax: 0.10.0
libtpu: 0.0.40
codegen_flags: <defaults>
</compile_context>

<pallas_src>
import functools

import jax
import jax.numpy as jnp
from jax.experimental import pallas as pl
from jax.experimental.pallas import tpu as pltpu

GENE_DIM = 34
NUM_CLASSES = 2
HIDDEN_DIMS = (64, 32, 16, 8)
LANE = 128  # pad every feature dim to one vreg lane width


# ----------------------------- VMEM budget -----------------------------------

def _default_vmem_limit_bytes():
    """Per-generation VMEM limit: physical capacity minus headroom."""
    try:
        cap = pltpu.get_tpu_info().vmem_capacity_bytes
        return int(min(cap - 8 * 1024 * 1024, 110 * 1024 * 1024))
    except Exception:
        return 32 * 1024 * 1024  # conservative fallback


_VMEM_LIMIT_BYTES = _default_vmem_limit_bytes()


# ----------------------------- Pallas kernel ---------------------------------

def _gcn_fused_kernel(a_ref, x_ref, w_ref, b_ref, out_ref):
    """Whole GCN forward in one kernel.

    a_ref  : [Np, Np]  bf16   symmetric-normalized adjacency
    x_ref  : [Np, LANE] f32   node features (zero-padded to LANE columns)
    w_ref  : [5, LANE, LANE] bf16  w1..w4 at col offset 0; wc at col offset 8
    b_ref  : [8, LANE] f32    rows 0..3 = b1..b4 (offset 0); row 4 = bc at
                              col offset 8; rows 5..7 unused padding
    out_ref: [Np, LANE] f32   lanes 0:8 = layer-4 tanh embedding h,
                              lanes 8:8+NUM_CLASSES = classifier logits
    """
    a = a_ref[...]                       # bf16
    b = b_ref[...]                       # f32
    h = x_ref[...]                       # f32
    hb = h.astype(jnp.bfloat16)          # MXU operand

    # 4 GCN layers, fully unrolled; intermediates never leave VMEM/vregs.
    for i in range(4):
        # (h @ W) first (contract the small feature dim), then A_hat against
        # the narrow [Np, LANE] operand.  Zero padding keeps padded feature
        # columns exactly zero through every layer.
        hw = jnp.dot(hb, w_ref[i], preferred_element_type=jnp.float32)
        z = jnp.dot(a, hw.astype(jnp.bfloat16),
                    preferred_element_type=jnp.float32)
        h = jnp.tanh(z + b[i][None, :])       # bias-add + tanh stay f32
        hb = h.astype(jnp.bfloat16)

    # Fused classifier.  wc/bc are pre-packed at column offset 8, so `logits`
    # is nonzero only in lanes 8:10 while `h` is nonzero only in lanes 0:8 —
    # a single add packs both into one lane-dense output.
    logits = jnp.dot(hb, w_ref[4], preferred_element_type=jnp.float32) \
        + b[4][None, :]
    out_ref[...] = (h + logits).astype(out_ref.dtype)


# ------------------------------- wrapper --------------------------------------

def _pad_block(a, shape, offsets=(0, 0)):
    out = jnp.zeros(shape, jnp.float32)
    idx = tuple(slice(o, o + s) for o, s in zip(offsets, a.shape))
    return out.at[idx].set(a.astype(jnp.float32))


def pack_params(params):
    """Pack weights/biases ONCE (outside the per-call jitted path).

    Returns (ws, bs):
      ws: [5, LANE, LANE] bf16 — w1..w4 padded at origin; wc padded at column
          offset HIDDEN_DIMS[-1] (=8) so logits land in lanes 8:10.
      bs: [8, LANE] f32 — b1..b4 at offset 0; bc at column offset 8.
    """
    off = HIDDEN_DIMS[-1]
    ws = jnp.stack([
        _pad_block(params["w1"], (LANE, LANE)),
        _pad_block(params["w2"], (LANE, LANE)),
        _pad_block(params["w3"], (LANE, LANE)),
        _pad_block(params["w4"], (LANE, LANE)),
        _pad_block(params["wc"], (LANE, LANE), offsets=(0, off)),
    ]).astype(jnp.bfloat16)

    bs = jnp.zeros((8, LANE), jnp.float32)
    for i, name in enumerate(("b1", "b2", "b3", "b4")):
        bs = bs.at[i, : params[name].shape[0]].set(params[name])
    bs = bs.at[4, off: off + NUM_CLASSES].set(params["bc"])
    return ws, bs


@jax.jit
def gcn_forward(ws, bs, x, a_hat):
    n = x.shape[0]
    n_pad = max(((n + 127) // 128) * 128, 128)  # lane/sublane aligned (bf16-safe)

    x_p = jnp.zeros((n_pad, LANE), jnp.float32).at[:n, : x.shape[1]].set(x)
    a_p = (jnp.zeros((n_pad, n_pad), jnp.bfloat16)
           .at[:n, :n].set(a_hat.astype(jnp.bfloat16)))

    vmem = pl.BlockSpec(memory_space=pltpu.MemorySpace.VMEM)
    packed = pl.pallas_call(
        _gcn_fused_kernel,
        out_shape=jax.ShapeDtypeStruct((n_pad, LANE), jnp.float32),
        in_specs=[vmem, vmem, vmem, vmem],
        out_specs=vmem,
        compiler_params=pltpu.CompilerParams(
            vmem_limit_bytes=_VMEM_LIMIT_BYTES,
        ),
    )(a_p, x_p, ws, bs)

    h = packed[:n, : HIDDEN_DIMS[-1]]
    out = packed[:n, HIDDEN_DIMS[-1]: HIDDEN_DIMS[-1] + NUM_CLASSES]
    return out, h


# ------------------------------- glue (JAX) ------------------------------------

def normalized_adjacency(edge_index, num_nodes):
    """A_hat = D^{-1/2} (A + I) D^{-1/2}  (PyG gcn_norm, unit edge weights).

    Duplicate edges are scatter-added.  add_remaining_self_loops semantics:
    existing self-loop edges are kept (their weights sum), and a weight-1 self
    loop is added only to nodes that have none.
    """
    src, dst = edge_index[0], edge_index[1]
    adj = jnp.zeros((num_nodes, num_nodes), jnp.float32)
    adj = adj.at[dst, src].add(1.0)               # message flows src -> dst
    diag = jnp.diagonal(adj)
    adj = adj + jnp.diag(jnp.where(diag > 0, 0.0, 1.0))
    deg = jnp.sum(adj, axis=1)
    d_inv_sqrt = jnp.where(deg > 0, jax.lax.rsqrt(deg), 0.0)
    return d_inv_sqrt[:, None] * adj * d_inv_sqrt[None, :]


def init_params(key):
    """Deterministic glorot-uniform-ish init matching the module's shapes."""
    dims = [(GENE_DIM, 64), (64, 32), (32, 16), (16, 8)]
    params = {}
    for i, (fi, fo) in enumerate(dims, start=1):
        key, kw = jax.random.split(key)
        lim = jnp.sqrt(6.0 / (fi + fo))
        params[f"w{i}"] = jax.random.uniform(kw, (fi, fo), jnp.float32, -lim, lim)
        params[f"b{i}"] = jnp.zeros((fo,), jnp.float32)
    key, kc = jax.random.split(key)
    lim = jnp.sqrt(6.0 / (8 + NUM_CLASSES))
    params["wc"] = jax.random.uniform(kc, (8, NUM_CLASSES), jnp.float32, -lim, lim)
    params["bc"] = jnp.zeros((NUM_CLASSES,), jnp.float32)
    return params


# --------------------------------- main -----------------------------------------

if __name__ == "__main__":
    key = jax.random.PRNGKey(0)
    num_nodes = 8
    num_edges = 16

    k_x, k_e, k_p = jax.random.split(key, 3)
    x = jax.random.normal(k_x, (num_nodes, GENE_DIM), jnp.float32)
    edge_index = jax.random.randint(k_e, (2, num_edges), 0, num_nodes, jnp.int32)

    a_hat = normalized_adjacency(edge_index, num_nodes)
    params = init_params(k_p)
    ws, bs = pack_params(params)   # packed ONCE, reused every forward call

    out, h = gcn_forward(ws, bs, x, a_hat)
    jax.block_until_ready((out, h))

    assert out.shape == (num_nodes, NUM_CLASSES)
    assert h.shape == (num_nodes, 8)
    assert bool(jnp.all(jnp.isfinite(out))) and bool(jnp.all(jnp.isfinite(h)))
    print("KERNEL_OK")
</pallas_src>

<mosaic_0001>
module attributes {stable_mosaic.version = 11 : i64} {
  func.func @_gcn_fused_kernel(%arg0: memref<128x128xbf16, #tpu.memory_space<vmem>>, %arg1: memref<128x128xf32, #tpu.memory_space<vmem>>, %arg2: memref<5x128x128xbf16, #tpu.memory_space<vmem>>, %arg3: memref<8x128xf32, #tpu.memory_space<vmem>>, %arg4: memref<128x128xf32, #tpu.memory_space<vmem>>) attributes {dimension_semantics = [], scalar_prefetch = 0 : i64, scratch_operands = 0 : i64, tpu.core_type = #tpu.core_type<tc>} {
    %c0 = arith.constant 0 : index
    %c0_0 = arith.constant 0 : index
    %0 = vector.load %arg0[%c0, %c0_0] : memref<128x128xbf16, #tpu.memory_space<vmem>>, vector<128x128xbf16>
    %c0_1 = arith.constant 0 : index
    %c0_2 = arith.constant 0 : index
    %1 = vector.load %arg3[%c0_1, %c0_2] : memref<8x128xf32, #tpu.memory_space<vmem>>, vector<8x128xf32>
    %c0_3 = arith.constant 0 : index
    %c0_4 = arith.constant 0 : index
    %2 = vector.load %arg1[%c0_3, %c0_4] : memref<128x128xf32, #tpu.memory_space<vmem>>, vector<128x128xf32>
    %3 = arith.truncf %2 : vector<128x128xf32> to vector<128x128xbf16>
    %c0_5 = arith.constant 0 : index
    %c0_6 = arith.constant 0 : index
    %c0_7 = arith.constant 0 : index
    %4 = vector.load %arg2[%c0_5, %c0_6, %c0_7] : memref<5x128x128xbf16, #tpu.memory_space<vmem>>, vector<1x128x128xbf16>
    %5 = vector.shape_cast %4 : vector<1x128x128xbf16> to vector<128x128xbf16>
    %cst = arith.constant dense<0.000000e+00> : vector<128x128xf32>
    %6 = tpu.matmul %3, %5, %cst {dimension_numbers = #tpu.dot_dimension_numbers<[1], [0], [0], [1], [0, 0, 1, 1], [], []>} : vector<128x128xbf16>, vector<128x128xbf16>, vector<128x128xf32> -> vector<128x128xf32>
    %7 = arith.truncf %6 : vector<128x128xf32> to vector<128x128xbf16>
    %cst_8 = arith.constant dense<0.000000e+00> : vector<128x128xf32>
    %8 = tpu.matmul %0, %7, %cst_8 {dimension_numbers = #tpu.dot_dimension_numbers<[1], [0], [0], [1], [0, 0, 1, 1], [], []>} : vector<128x128xbf16>, vector<128x128xbf16>, vector<128x128xf32> -> vector<128x128xf32>
    %9 = vector.extract_strided_slice %1 {offsets = [0, 0], sizes = [1, 128], strides = [1, 1]} : vector<8x128xf32> to vector<1x128xf32>
    %10 = vector.shape_cast %9 : vector<1x128xf32> to vector<128xf32>
    %11 = vector.shape_cast %10 : vector<128xf32> to vector<1x128xf32>
    %12 = vector.broadcast %11 : vector<1x128xf32> to vector<128x128xf32>
    %13 = arith.addf %8, %12 : vector<128x128xf32>
    %14 = math.tanh %13 : vector<128x128xf32>
    %15 = arith.truncf %14 : vector<128x128xf32> to vector<128x128xbf16>
    %c1 = arith.constant 1 : index
    %c0_9 = arith.constant 0 : index
    %c0_10 = arith.constant 0 : index
    %16 = vector.load %arg2[%c1, %c0_9, %c0_10] : memref<5x128x128xbf16, #tpu.memory_space<vmem>>, vector<1x128x128xbf16>
    %17 = vector.shape_cast %16 : vector<1x128x128xbf16> to vector<128x128xbf16>
    %cst_11 = arith.constant dense<0.000000e+00> : vector<128x128xf32>
    %18 = tpu.matmul %15, %17, %cst_11 {dimension_numbers = #tpu.dot_dimension_numbers<[1], [0], [0], [1], [0, 0, 1, 1], [], []>} : vector<128x128xbf16>, vector<128x128xbf16>, vector<128x128xf32> -> vector<128x128xf32>
    %19 = arith.truncf %18 : vector<128x128xf32> to vector<128x128xbf16>
    %cst_12 = arith.constant dense<0.000000e+00> : vector<128x128xf32>
    %20 = tpu.matmul %0, %19, %cst_12 {dimension_numbers = #tpu.dot_dimension_numbers<[1], [0], [0], [1], [0, 0, 1, 1], [], []>} : vector<128x128xbf16>, vector<128x128xbf16>, vector<128x128xf32> -> vector<128x128xf32>
    %21 = vector.extract_strided_slice %1 {offsets = [1, 0], sizes = [1, 128], strides = [1, 1]} : vector<8x128xf32> to vector<1x128xf32>
    %22 = vector.shape_cast %21 : vector<1x128xf32> to vector<128xf32>
    %23 = vector.shape_cast %22 : vector<128xf32> to vector<1x128xf32>
    %24 = vector.broadcast %23 : vector<1x128xf32> to vector<128x128xf32>
    %25 = arith.addf %20, %24 : vector<128x128xf32>
    %26 = math.tanh %25 : vector<128x128xf32>
    %27 = arith.truncf %26 : vector<128x128xf32> to vector<128x128xbf16>
    %c2 = arith.constant 2 : index
    %c0_13 = arith.constant 0 : index
    %c0_14 = arith.constant 0 : index
    %28 = vector.load %arg2[%c2, %c0_13, %c0_14] : memref<5x128x128xbf16, #tpu.memory_space<vmem>>, vector<1x128x128xbf16>
    %29 = vector.shape_cast %28 : vector<1x128x128xbf16> to vector<128x128xbf16>
    %cst_15 = arith.constant dense<0.000000e+00> : vector<128x128xf32>
    %30 = tpu.matmul %27, %29, %cst_15 {dimension_numbers = #tpu.dot_dimension_numbers<[1], [0], [0], [1], [0, 0, 1, 1], [], []>} : vector<128x128xbf16>, vector<128x128xbf16>, vector<128x128xf32> -> vector<128x128xf32>
    %31 = arith.truncf %30 : vector<128x128xf32> to vector<128x128xbf16>
    %cst_16 = arith.constant dense<0.000000e+00> : vector<128x128xf32>
    %32 = tpu.matmul %0, %31, %cst_16 {dimension_numbers = #tpu.dot_dimension_numbers<[1], [0], [0], [1], [0, 0, 1, 1], [], []>} : vector<128x128xbf16>, vector<128x128xbf16>, vector<128x128xf32> -> vector<128x128xf32>
    %33 = vector.extract_strided_slice %1 {offsets = [2, 0], sizes = [1, 128], strides = [1, 1]} : vector<8x128xf32> to vector<1x128xf32>
    %34 = vector.shape_cast %33 : vector<1x128xf32> to vector<128xf32>
    %35 = vector.shape_cast %34 : vector<128xf32> to vector<1x128xf32>
    %36 = vector.broadcast %35 : vector<1x128xf32> to vector<128x128xf32>
    %37 = arith.addf %32, %36 : vector<128x128xf32>
    %38 = math.tanh %37 : vector<128x128xf32>
    %39 = arith.truncf %38 : vector<128x128xf32> to vector<128x128xbf16>
    %c3 = arith.constant 3 : index
    %c0_17 = arith.constant 0 : index
    %c0_18 = arith.constant 0 : index
    %40 = vector.load %arg2[%c3, %c0_17, %c0_18] : memref<5x128x128xbf16, #tpu.memory_space<vmem>>, vector<1x128x128xbf16>
    %41 = vector.shape_cast %40 : vector<1x128x128xbf16> to vector<128x128xbf16>
    %cst_19 = arith.constant dense<0.000000e+00> : vector<128x128xf32>
    %42 = tpu.matmul %39, %41, %cst_19 {dimension_numbers = #tpu.dot_dimension_numbers<[1], [0], [0], [1], [0, 0, 1, 1], [], []>} : vector<128x128xbf16>, vector<128x128xbf16>, vector<128x128xf32> -> vector<128x128xf32>
    %43 = arith.truncf %42 : vector<128x128xf32> to vector<128x128xbf16>
    %cst_20 = arith.constant dense<0.000000e+00> : vector<128x128xf32>
    %44 = tpu.matmul %0, %43, %cst_20 {dimension_numbers = #tpu.dot_dimension_numbers<[1], [0], [0], [1], [0, 0, 1, 1], [], []>} : vector<128x128xbf16>, vector<128x128xbf16>, vector<128x128xf32> -> vector<128x128xf32>
    %45 = vector.extract_strided_slice %1 {offsets = [3, 0], sizes = [1, 128], strides = [1, 1]} : vector<8x128xf32> to vector<1x128xf32>
    %46 = vector.shape_cast %45 : vector<1x128xf32> to vector<128xf32>
    %47 = vector.shape_cast %46 : vector<128xf32> to vector<1x128xf32>
    %48 = vector.broadcast %47 : vector<1x128xf32> to vector<128x128xf32>
    %49 = arith.addf %44, %48 : vector<128x128xf32>
    %50 = math.tanh %49 : vector<128x128xf32>
    %51 = arith.truncf %50 : vector<128x128xf32> to vector<128x128xbf16>
    %c4 = arith.constant 4 : index
    %c0_21 = arith.constant 0 : index
    %c0_22 = arith.constant 0 : index
    %52 = vector.load %arg2[%c4, %c0_21, %c0_22] : memref<5x128x128xbf16, #tpu.memory_space<vmem>>, vector<1x128x128xbf16>
    %53 = vector.shape_cast %52 : vector<1x128x128xbf16> to vector<128x128xbf16>
    %cst_23 = arith.constant dense<0.000000e+00> : vector<128x128xf32>
    %54 = tpu.matmul %51, %53, %cst_23 {dimension_numbers = #tpu.dot_dimension_numbers<[1], [0], [0], [1], [0, 0, 1, 1], [], []>} : vector<128x128xbf16>, vector<128x128xbf16>, vector<128x128xf32> -> vector<128x128xf32>
    %55 = vector.extract_strided_slice %1 {offsets = [4, 0], sizes = [1, 128], strides = [1, 1]} : vector<8x128xf32> to vector<1x128xf32>
    %56 = vector.shape_cast %55 : vector<1x128xf32> to vector<128xf32>
    %57 = vector.shape_cast %56 : vector<128xf32> to vector<1x128xf32>
    %58 = vector.broadcast %57 : vector<1x128xf32> to vector<128x128xf32>
    %59 = arith.addf %54, %58 : vector<128x128xf32>
    %60 = arith.addf %50, %59 : vector<128x128xf32>
    %c0_24 = arith.constant 0 : index
    %c0_25 = arith.constant 0 : index
    %61 = vector.load %arg4[%c0_24, %c0_25] : memref<128x128xf32, #tpu.memory_space<vmem>>, vector<128x128xf32>
    tpu.vector_store %arg4[%c0_24, %c0_25], %60 {strides = array<i32>} : memref<128x128xf32, #tpu.memory_space<vmem>>, vector<128x128xf32>,
    return
  }
}

</mosaic_0001>

<bundles_post_ra>
// kernel: gcn_forward.1
= control target key start
LH: loop header
LB: loop body
LE: loop exit
PB: predicated region body
PF: predicated region fallthrough
CT: control target
= control target key end

     0   :  { %9 = vsyncpa [#allocation3], 0  ;;  %s2203_s15 = smov [#allocation2]   ;;  %s2466_s0 = inlined_call_operand.vmem [shape: bf16[128,128], index: 0, kind: input, shape index: {}]   ;;  %s2467_s1 = inlined_call_operand.vmem [shape: f32[128,128], index: 1, kind: input, shape index: {}]   ;;  %s2468_s2 = inlined_call_operand.hbm [shape: bf16[5,128,128], index: 2, kind: input, shape index: {}]   ;;  %s2469_s3 = inlined_call_operand.vmem [shape: f32[8,128], index: 3, kind: input, shape index: {}]   ;;  %s2470_s4 = inlined_call_operand.vmem [shape: f32[128,128], index: 4, kind: output, shape index: {}]  }
   0x1   :  { %s19_s16 = sshll.u32 %s2203_s15, 4  ;;  %s2179_s19 = scalar_lea.hbm %s2468_s2, 5120  ;;  %s20_s16 = int_to_ptr.vmem [resolvable:$true] %s19_s16 }
   0x2   :  { %p2180_p0 = scmp.ne.s32.totalorder %s2468_s2, %s2179_s19  ;;  %p2183_p1 = scmp.lt.u32.totalorder %s2179_s19, %s2468_s2 }
   0x4   :  { %p2185_p2 = pnand %p2183_p1, %p2180_p0 }
   0x6   :  { %2188 = shalt.err (!%p2185_p2)
}
   0x7   :  { %s2189_s24 = scalar_lea.vmem %s20_s16, 5120  ;;  %p2194_p4 = scmp.lt.s32.totalorder %s20_s16, %s20_s16 }
   0x8   :  { %p2190_p3 = scmp.ne.s32.totalorder %s20_s16, %s2189_s24  ;;  %p2195_p5 = scmp.lt.s32.totalorder %s2189_s24, %s2189_s24 }
   0xa   :  { %p2196_p6 = por %p2195_p5, %p2194_p4 }
   0xc   :  { %p2197_p7 = pnand %p2196_p6, %p2190_p3 }
   0xe   :  { %2200 = shalt.err (!%p2197_p7)
}
   0xf   :  { %s2204_s25 = smov 64   ;;  %s2205_s26 = smov 4  }
  0x10   :  { %25 = dma.hbm_to_vmem [thread:$0]  %s2468_s2, 5120, %s20_s16, [#allocation3], %s2204_s25, %s2204_s25, %s2205_s26  }
  0x11   :  { %2201 = dma.done.wait [#allocation3], 5120  }
  0x12   :  { %2202 = vsyncadd [#allocation3], 4294962176  ;;  %v2002_v0 = vld [vmem:[#allocation2] sm:$0xff]   ;;  %v2003_v1 = vld [vmem:[#allocation2 + $0x8] sm:$0xff]  }
  0x13   :  { %1695 = vmatprep.subr.bf16.mxu0 %v2002_v0  ;;  %v2004_v2 = vld [vmem:[#allocation2 + $0x10] sm:$0xff]   ;;  %v2005_v3 = vld [vmem:[#allocation2 + $0x18] sm:$0xff]   ;;  %v49_v4 = vld [vmem:[%s2467_s1] sm:$0xff] }
  0x14   :  { %1696 = vmatpush3.bf16.msra.mxu0 %v2002_v0  ;;  %v50_v5 = vld [vmem:[%s2467_s1 + $0x8] sm:$0xff]  ;;  %v2006_v7 = vld [vmem:[#allocation2 + $0x20] sm:$0xff]   ;;  %v2008_v9 = vld [vmem:[#allocation2 + $0x30] sm:$0xff]  }
  0x15   :  { %1697 = vmatprep.subr.bf16.mxu0 %v2003_v1  ;;  %v65_v6 = vpack.c.bf16 %v50_v5, %v49_v4  ;;  %v2007_v8 = vld [vmem:[#allocation2 + $0x28] sm:$0xff]   ;;  %v2009_v10 = vld [vmem:[#allocation2 + $0x38] sm:$0xff]   ;;  %v51_v11 = vld [vmem:[%s2467_s1 + $0x10] sm:$0xff] }
  0x16   :  { %v52_v12 = vld [vmem:[%s2467_s1 + $0x18] sm:$0xff]  ;;  %v53_v13 = vld [vmem:[%s2467_s1 + $0x20] sm:$0xff]  ;;  %v54_v14 = vld [vmem:[%s2467_s1 + $0x28] sm:$0xff] }
  0x17   :  { %1711 = vmatprep.mubr.bf16.mxu0 %v65_v6  ;;  %v66_v15 = vpack.c.bf16 %v52_v12, %v51_v11  ;;  %v67_v16 = vpack.c.bf16 %v54_v14, %v53_v13  ;;  %v55_v17 = vld [vmem:[%s2467_s1 + $0x30] sm:$0xff]  ;;  %v56_v18 = vld [vmem:[%s2467_s1 + $0x38] sm:$0xff]  ;;  %v57_v19 = vld [vmem:[%s2467_s1 + $0x40] sm:$0xff] }
  0x18   :  { %1698 = vmatpush3.bf16.msra.mxu0 %v2003_v1  ;;  %v58_v20 = vld [vmem:[%s2467_s1 + $0x48] sm:$0xff]  ;;  %v68_v21 = vpack.c.bf16 %v56_v18, %v55_v17  ;;  %v59_v23 = vld [vmem:[%s2467_s1 + $0x50] sm:$0xff]  ;;  %v60_v24 = vld [vmem:[%s2467_s1 + $0x58] sm:$0xff] }
  0x19   :  { %1699 = vmatprep.subr.bf16.mxu0 %v2004_v2  ;;  %v69_v22 = vpack.c.bf16 %v58_v20, %v57_v19  ;;  %v61_v25 = vld [vmem:[%s2467_s1 + $0x60] sm:$0xff]  ;;  %v62_v26 = vld [vmem:[%s2467_s1 + $0x68] sm:$0xff]  ;;  %v70_v27 = vpack.c.bf16 %v60_v24, %v59_v23  ;;  %v63_v29 = vld [vmem:[%s2467_s1 + $0x70] sm:$0xff] }
  0x1a   :  { %v71_v28 = vpack.c.bf16 %v62_v26, %v61_v25  ;;  %v64_v30 = vld [vmem:[%s2467_s1 + $0x78] sm:$0xff]  ;;  %v2294_v32 = vld [vmem:[%s2466_s0] sm:$0xff]   ;;  %v2019_v34 = vld [vmem:[#allocation2 + $0x48] sm:$0xff]  }
  0x1b   :  { %v72_v31 = vpack.c.bf16 %v64_v30, %v63_v29  ;;  %1743 = vmatprep.mubr.bf16.mxu1 %v2294_v32  ;;  %v2018_v33 = vld [vmem:[#allocation2 + $0x40] sm:$0xff]   ;;  %v2020_v35 = vld [vmem:[#allocation2 + $0x50] sm:$0xff]   ;;  %v2300_v60 = vld [vmem:[%s2466_s0 + $0x8] sm:$0xff]  }
  0x1c   :  { %1700 = vmatpush3.bf16.msra.mxu0 %v2004_v2  ;;  %v2305_v61 = vld [vmem:[%s2466_s0 + $0x10] sm:$0xff]   ;;  %v2312_v62 = vld [vmem:[%s2466_s0 + $0x18] sm:$0xff]   ;;  %v2317_v63 = vld [vmem:[%s2466_s0 + $0x20] sm:$0xff]  }
  0x1d   :  { %1701 = vmatprep.subr.bf16.mxu0 %v2005_v3  ;;  %v2324_v0 = vld [vmem:[%s2466_s0 + $0x28] sm:$0xff]   ;;  %v2329_v1 = vld [vmem:[%s2466_s0 + $0x30] sm:$0xff]   ;;  %v2336_v2 = vld [vmem:[%s2466_s0 + $0x38] sm:$0xff]  }
  0x1e   :  { %v2022_v4 = vld [vmem:[#allocation2 + $0x60] sm:$0xff]   ;;  %v2023_v5 = vld [vmem:[#allocation2 + $0x68] sm:$0xff]   ;;  %v2024_v6 = vld [vmem:[#allocation2 + $0x70] sm:$0xff]  }
  0x1f   :  { %v2346_v11 = vld [vmem:[%s2469_s3] sm:$0xff] }
  0x20   :  { %1702 = vmatpush3.bf16.msra.mxu0 %v2005_v3  ;;  %v2021_v3 = vld [vmem:[#allocation2 + $0x58] sm:$0xff]  }
  0x21   :  { %1703 = vmatprep.subr.bf16.mxu0 %v2006_v7 }
  0x24   :  { %1704 = vmatpush3.bf16.msra.mxu0 %v2006_v7  ;;  %v2025_v7 = vld [vmem:[#allocation2 + $0x78] sm:$0xff]  }
  0x25   :  { %1705 = vmatprep.subr.bf16.mxu0 %v2007_v8 }
  0x28   :  { %1706 = vmatpush3.bf16.msra.mxu0 %v2007_v8  ;;  %v242_v8 = vlaneseq }
  0x29   :  { %1707 = vmatprep.subr.bf16.mxu0 %v2008_v9 }
  0x2c   :  { %1708 = vmatpush3.bf16.msra.mxu0 %v2008_v9  ;;  %v2340_v9 = vshrl.u32 %v242_v8, 7 }
  0x2d   :  { %1709 = vmatprep.subr.bf16.mxu0 %v2009_v10 }
  0x30   :  { %1710 = vmatpush3.bf16.msra.mxu0 %v2009_v10  ;;  %v244_v10 = vsub.s32 0, %v2340_v9 }
  0x31   :  { %1759 = vmatprep.subr.bf16.mxu0 %v2018_v33 }
  0x32   :  { %v245_v12 = vrot.slane %v2346_v11, %v244_v10 }
  0x33   :  { %1712 = vmatmul.mubr.bf16.vlgmr.msra.gmra.mrb[0].mxu0 %v66_v15 }
  0x34   :  { %1715 = vmatprep.mubr.bf16.mxu0 %v67_v16  ;;  %1760 = vmatpush3.bf16.msra.mxu0 %v2018_v33 }
  0x35   :  { %1761 = vmatprep.subr.bf16.mxu0 %v2019_v34 }
  0x38   :  { %1762 = vmatpush3.bf16.msra.mxu0 %v2019_v34 }
  0x39   :  { %1763 = vmatprep.subr.bf16.mxu0 %v2020_v35 }
  0x3b   :  { %1716 = vmatmul.mubr.bf16.gmra.mrb[4].mxu0 %v68_v21 }
  0x3c   :  { %1719 = vmatprep.mubr.bf16.mxu0 %v69_v22  ;;  %1764 = vmatpush3.bf16.msra.mxu0 %v2020_v35 }
  0x3d   :  { %1765 = vmatprep.subr.bf16.mxu0 %v2021_v3 }
  0x40   :  { %1766 = vmatpush3.bf16.msra.mxu0 %v2021_v3 }
  0x41   :  { %1767 = vmatprep.subr.bf16.mxu0 %v2022_v4 }
  0x43   :  { %1720 = vmatmul.mubr.bf16.gmra.mrb[8].mxu0 %v70_v27 }
  0x44   :  { %1723 = vmatprep.mubr.bf16.mxu0 %v71_v28  ;;  %1768 = vmatpush3.bf16.msra.mxu0 %v2022_v4 }
  0x45   :  { %1769 = vmatprep.subr.bf16.mxu0 %v2023_v5 }
  0x48   :  { %1770 = vmatpush3.bf16.msra.mxu0 %v2023_v5 }
  0x49   :  { %1771 = vmatprep.subr.bf16.mxu0 %v2024_v6 }
  0x4b   :  { %1724 = vmatmul.mubr.bf16.gmra.mrb[12].mxu0 %v72_v31 }
  0x4c   :  { %1772 = vmatpush3.bf16.msra.mxu0 %v2024_v6 }
  0x4d   :  { %1773 = vmatprep.subr.bf16.mxu0 %v2025_v7 }
  0x50   :  { %1774 = vmatpush3.bf16.msra.mxu0 %v2025_v7 }
 0x106   :  { %v1713_v36 = vpop.f32.mrb[0].mxu0 }
 0x107   :  { %v171_v37 = vpop.f32.mrb[1].mxu0 }
 0x108   :  { %v1714_v38 = vpop.f32.mrb[2].mxu0 }
 0x109   :  { %v235_v39 = vpack.c.bf16 %v1714_v38, %v1713_v36  ;;  %v174_v40 = vpop.f32.mrb[3].mxu0 }
 0x10a   :  { %v234_v41 = vpack.c.bf16 %v174_v40, %v171_v37 }
 0x10c   :  { %1727 = vmatprep.subr.bf16.mxu1 %v234_v41 }
 0x10d   :  { %1728 = vmatpush3.bf16.msra.mxu1 %v234_v41 }
 0x10e   :  { %v1717_v42 = vpop.f32.mrb[4].mxu0  ;;  %1729 = vmatprep.subr.bf16.mxu1 %v235_v39 }
 0x10f   :  { %v187_v43 = vpop.f32.mrb[5].mxu0 }
 0x110   :  { %v1718_v44 = vpop.f32.mrb[6].mxu0 }
 0x111   :  { %v237_v45 = vpack.c.bf16 %v1718_v44, %v1717_v42  ;;  %v190_v46 = vpop.f32.mrb[7].mxu0  ;;  %1730 = vmatpush3.bf16.msra.mxu1 %v235_v39 }
 0x112   :  { %v236_v47 = vpack.c.bf16 %v190_v46, %v187_v43 }
 0x114   :  { %1731 = vmatprep.subr.bf16.mxu1 %v236_v47 }
 0x115   :  { %1732 = vmatpush3.bf16.msra.mxu1 %v236_v47 }
 0x116   :  { %v1721_v48 = vpop.f32.mrb[8].mxu0  ;;  %1733 = vmatprep.subr.bf16.mxu1 %v237_v45 }
 0x117   :  { %v203_v49 = vpop.f32.mrb[9].mxu0 }
 0x118   :  { %v1722_v50 = vpop.f32.mrb[10].mxu0 }
 0x119   :  { %v239_v51 = vpack.c.bf16 %v1722_v50, %v1721_v48  ;;  %v206_v52 = vpop.f32.mrb[11].mxu0  ;;  %1734 = vmatpush3.bf16.msra.mxu1 %v237_v45 }
 0x11a   :  { %v238_v53 = vpack.c.bf16 %v206_v52, %v203_v49 }
 0x11c   :  { %1735 = vmatprep.subr.bf16.mxu1 %v238_v53 }
 0x11d   :  { %1736 = vmatpush3.bf16.msra.mxu1 %v238_v53 }
 0x11e   :  { %v1725_v54 = vpop.f32.mrb[12].mxu0  ;;  %1737 = vmatprep.subr.bf16.mxu1 %v239_v51 }
 0x11f   :  { %v219_v55 = vpop.f32.mrb[13].mxu0 }
 0x120   :  { %v1726_v56 = vpop.f32.mrb[14].mxu0 }
 0x121   :  { %v241_v57 = vpack.c.bf16 %v1726_v56, %v1725_v54  ;;  %v222_v58 = vpop.f32.mrb[15].mxu0  ;;  %1738 = vmatpush3.bf16.msra.mxu1 %v239_v51 }
 0x122   :  { %v240_v59 = vpack.c.bf16 %v222_v58, %v219_v55 }
 0x124   :  { %1739 = vmatprep.subr.bf16.mxu1 %v240_v59 }
 0x125   :  { %1740 = vmatpush3.bf16.msra.mxu1 %v240_v59 }
 0x126   :  { %1741 = vmatprep.subr.bf16.mxu1 %v241_v57 }
 0x129   :  { %1742 = vmatpush3.bf16.msra.mxu1 %v241_v57 }
 0x12c   :  { %1744 = vmatmul.mubr.bf16.vlgmr.msra.gmra.mrb[0].mxu1 %v2300_v60 }
 0x12d   :  { %1747 = vmatprep.mubr.bf16.mxu1 %v2305_v61 }
 0x134   :  { %1748 = vmatmul.mubr.bf16.gmra.mrb[4].mxu1 %v2312_v62 }
 0x135   :  { %1751 = vmatprep.mubr.bf16.mxu1 %v2317_v63 }
 0x13c   :  { %1752 = vmatmul.mubr.bf16.gmra.mrb[8].mxu1 %v2324_v0 }
 0x13d   :  { %1755 = vmatprep.mubr.bf16.mxu1 %v2329_v1 }
 0x144   :  { %1756 = vmatmul.mubr.bf16.gmra.mrb[12].mxu1 %v2336_v2 }
 0x145   :  { %1807 = vmatprep.mubr.bf16.mxu1 %v2294_v32 }
 0x1ff   :  { %v1745_v13 = vpop.f32.mrb[0].mxu1 }
 0x200   :  { %v337_v14 = vadd.f32 %v1745_v13, %v245_v12  ;;  %v328_v15 = vpop.f32.mrb[1].mxu1 }
 0x201   :  { %v329_v16 = vadd.f32 %v328_v15, %v245_v12  ;;  %v1746_v17 = vpop.f32.mrb[2].mxu1 }
 0x202   :  { %2050 = vtanh.f32 %v337_v14  ;;  %v340_v18 = vadd.f32 %v1746_v17, %v245_v12  ;;  %v331_v19 = vpop.f32.mrb[3].mxu1  ;;  %v2028_v17 = vld [vmem:[#allocation2 + $0x90] sm:$0xff]  }
 0x203   :  { %2052 = vtanh.f32 %v329_v16  ;;  %v332_v20 = vadd.f32 %v331_v19, %v245_v12  ;;  %v2027_v16 = vld [vmem:[#allocation2 + $0x88] sm:$0xff]  }
 0x204   :  { %2054 = vtanh.f32 %v340_v18 }
 0x205   :  { %2056 = vtanh.f32 %v332_v20 }
 0x207   :  { %v1749_v21 = vpop.f32.mrb[4].mxu1 }
 0x208   :  { %v353_v22 = vadd.f32 %v1749_v21, %v245_v12  ;;  %v344_v23 = vpop.f32.mrb[5].mxu1 }
 0x209   :  { %v345_v24 = vadd.f32 %v344_v23, %v245_v12  ;;  %v1750_v25 = vpop.f32.mrb[6].mxu1 }
 0x20a   :  { %2058 = vtanh.f32 %v353_v22  ;;  %v356_v26 = vadd.f32 %v1750_v25, %v245_v12  ;;  %v347_v27 = vpop.f32.mrb[7].mxu1 }
 0x20b   :  { %2060 = vtanh.f32 %v345_v24  ;;  %v348_v28 = vadd.f32 %v347_v27, %v245_v12 }
 0x20c   :  { %v2051_v29 = vpop.eup %2050  ;;  %2062 = vtanh.f32 %v356_v26 }
 0x20d   :  { %v2053_v30 = vpop.eup %2052  ;;  %2064 = vtanh.f32 %v348_v28 }
 0x20e   :  { %v2055_v31 = vpop.eup %2054 }
 0x20f   :  { %v2057_v33 = vpop.eup %2056  ;;  %v1753_v34 = vpop.f32.mrb[8].mxu1  ;;  %v408_v35 = vpack.c.bf16 %v2055_v31, %v2051_v29 }
 0x210   :  { %v369_v36 = vadd.f32 %v1753_v34, %v245_v12  ;;  %v360_v37 = vpop.f32.mrb[9].mxu1  ;;  %v407_v38 = vpack.c.bf16 %v2057_v33, %v2053_v30 }
 0x211   :  { %v361_v39 = vadd.f32 %v360_v37, %v245_v12  ;;  %v1754_v40 = vpop.f32.mrb[10].mxu1 }
 0x212   :  { %2066 = vtanh.f32 %v369_v36  ;;  %v372_v41 = vadd.f32 %v1754_v40, %v245_v12  ;;  %v363_v42 = vpop.f32.mrb[11].mxu1  ;;  %1775 = vmatprep.mubr.bf16.mxu0 %v407_v38 }
 0x213   :  { %2068 = vtanh.f32 %v361_v39  ;;  %v364_v43 = vadd.f32 %v363_v42, %v245_v12  ;;  %1776 = vmatmul.mubr.bf16.vlgmr.msra.gmra.mrb[16].mxu0 %v408_v35 }
 0x214   :  { %v2059_v44 = vpop.eup %2058  ;;  %2070 = vtanh.f32 %v372_v41 }
 0x215   :  { %v2061_v45 = vpop.eup %2060  ;;  %2072 = vtanh.f32 %v364_v43  ;;  %v2029_v43 = vld [vmem:[#allocation2 + $0x98] sm:$0xff]  }
 0x216   :  { %v2063_v46 = vpop.eup %2062 }
 0x217   :  { %v2065_v47 = vpop.eup %2064  ;;  %v1757_v48 = vpop.f32.mrb[12].mxu1  ;;  %v410_v49 = vpack.c.bf16 %v2063_v46, %v2059_v44  ;;  %v2030_v44 = vld [vmem:[#allocation2 + $0xa0] sm:$0xff]   ;;  %v2032_v46 = vld [vmem:[#allocation2 + $0xb0] sm:$0xff]  }
 0x218   :  { %v385_v50 = vadd.f32 %v1757_v48, %v245_v12  ;;  %v376_v51 = vpop.f32.mrb[13].mxu1  ;;  %v409_v52 = vpack.c.bf16 %v2065_v47, %v2061_v45  ;;  %v2031_v45 = vld [vmem:[#allocation2 + $0xa8] sm:$0xff]   ;;  %v2033_v47 = vld [vmem:[#allocation2 + $0xb8] sm:$0xff]   ;;  %v587_v48 = vsub.s32 1, %v2340_v9 }
 0x219   :  { %v377_v53 = vadd.f32 %v376_v51, %v245_v12  ;;  %v1758_v54 = vpop.f32.mrb[14].mxu1 }
 0x21a   :  { %2074 = vtanh.f32 %v385_v50  ;;  %v388_v55 = vadd.f32 %v1758_v54, %v245_v12  ;;  %v379_v56 = vpop.f32.mrb[15].mxu1  ;;  %1779 = vmatprep.mubr.bf16.mxu0 %v409_v52 }
 0x21b   :  { %2076 = vtanh.f32 %v377_v53  ;;  %v380_v57 = vadd.f32 %v379_v56, %v245_v12  ;;  %1780 = vmatmul.mubr.bf16.gmra.mrb[20].mxu0 %v410_v49  ;;  %v2026_v12 = vld [vmem:[#allocation2 + $0x80] sm:$0xff]   ;;  %v588_v49 = vrot.slane %v2346_v11, %v587_v48 }
 0x21c   :  { %v2067_v58 = vpop.eup %2066  ;;  %2078 = vtanh.f32 %v388_v55  ;;  %1823 = vmatprep.subr.bf16.mxu0 %v2026_v12 }
 0x21d   :  { %v2069_v59 = vpop.eup %2068  ;;  %2080 = vtanh.f32 %v380_v57  ;;  %1824 = vmatpush3.bf16.msra.mxu0 %v2026_v12 }
 0x21e   :  { %v2071_v3 = vpop.eup %2070  ;;  %1825 = vmatprep.subr.bf16.mxu0 %v2027_v16 }
 0x21f   :  { %v2073_v4 = vpop.eup %2072  ;;  %v412_v5 = vpack.c.bf16 %v2071_v3, %v2067_v58 }
 0x220   :  { %v411_v6 = vpack.c.bf16 %v2073_v4, %v2069_v59 }
 0x221   :  { %1826 = vmatpush3.bf16.msra.mxu0 %v2027_v16 }
 0x222   :  { %1783 = vmatprep.mubr.bf16.mxu0 %v411_v6  ;;  %1827 = vmatprep.subr.bf16.mxu0 %v2028_v17 }
 0x223   :  { %1784 = vmatmul.mubr.bf16.gmra.mrb[24].mxu0 %v412_v5 }
 0x224   :  { %v2075_v7 = vpop.eup %2074 }
 0x225   :  { %v2077_v8 = vpop.eup %2076  ;;  %1828 = vmatpush3.bf16.msra.mxu0 %v2028_v17 }
 0x226   :  { %v2079_v10 = vpop.eup %2078  ;;  %1829 = vmatprep.subr.bf16.mxu0 %v2029_v43 }
 0x227   :  { %v2081_v13 = vpop.eup %2080  ;;  %v414_v14 = vpack.c.bf16 %v2079_v10, %v2075_v7 }
 0x228   :  { %v413_v15 = vpack.c.bf16 %v2081_v13, %v2077_v8 }
 0x229   :  { %1830 = vmatpush3.bf16.msra.mxu0 %v2029_v43 }
 0x22a   :  { %1787 = vmatprep.mubr.bf16.mxu0 %v413_v15  ;;  %1831 = vmatprep.subr.bf16.mxu0 %v2030_v44 }
 0x22b   :  { %1788 = vmatmul.mubr.bf16.gmra.mrb[28].mxu0 %v414_v14 }
 0x22d   :  { %1832 = vmatpush3.bf16.msra.mxu0 %v2030_v44 }
 0x22e   :  { %1833 = vmatprep.subr.bf16.mxu0 %v2031_v45 }
 0x231   :  { %1834 = vmatpush3.bf16.msra.mxu0 %v2031_v45 }
 0x232   :  { %1835 = vmatprep.subr.bf16.mxu0 %v2032_v46 }
 0x235   :  { %1836 = vmatpush3.bf16.msra.mxu0 %v2032_v46 }
 0x236   :  { %1837 = vmatprep.subr.bf16.mxu0 %v2033_v47 }
 0x239   :  { %1838 = vmatpush3.bf16.msra.mxu0 %v2033_v47 }
 0x2e6   :  { %v1777_v18 = vpop.f32.mrb[16].mxu0 }
 0x2e7   :  { %v514_v19 = vpop.f32.mrb[17].mxu0 }
 0x2e8   :  { %v1778_v20 = vpop.f32.mrb[18].mxu0 }
 0x2e9   :  { %v578_v21 = vpack.c.bf16 %v1778_v20, %v1777_v18  ;;  %v517_v22 = vpop.f32.mrb[19].mxu0 }
 0x2ea   :  { %v577_v23 = vpack.c.bf16 %v517_v22, %v514_v19 }
 0x2ec   :  { %1791 = vmatprep.subr.bf16.mxu1 %v577_v23 }
 0x2ed   :  { %1792 = vmatpush3.bf16.msra.mxu1 %v577_v23 }
 0x2ee   :  { %v1781_v24 = vpop.f32.mrb[20].mxu0  ;;  %1793 = vmatprep.subr.bf16.mxu1 %v578_v21 }
 0x2ef   :  { %v530_v25 = vpop.f32.mrb[21].mxu0 }
 0x2f0   :  { %v1782_v26 = vpop.f32.mrb[22].mxu0 }
 0x2f1   :  { %v580_v27 = vpack.c.bf16 %v1782_v26, %v1781_v24  ;;  %v533_v28 = vpop.f32.mrb[23].mxu0  ;;  %1794 = vmatpush3.bf16.msra.mxu1 %v578_v21 }
 0x2f2   :  { %v579_v29 = vpack.c.bf16 %v533_v28, %v530_v25 }
 0x2f4   :  { %1795 = vmatprep.subr.bf16.mxu1 %v579_v29 }
 0x2f5   :  { %1796 = vmatpush3.bf16.msra.mxu1 %v579_v29 }
 0x2f6   :  { %v1785_v30 = vpop.f32.mrb[24].mxu0  ;;  %1797 = vmatprep.subr.bf16.mxu1 %v580_v27 }
 0x2f7   :  { %v546_v31 = vpop.f32.mrb[25].mxu0 }
 0x2f8   :  { %v1786_v33 = vpop.f32.mrb[26].mxu0 }
 0x2f9   :  { %v582_v34 = vpack.c.bf16 %v1786_v33, %v1785_v30  ;;  %v549_v35 = vpop.f32.mrb[27].mxu0  ;;  %1798 = vmatpush3.bf16.msra.mxu1 %v580_v27 }
 0x2fa   :  { %v581_v36 = vpack.c.bf16 %v549_v35, %v546_v31 }
 0x2fc   :  { %1799 = vmatprep.subr.bf16.mxu1 %v581_v36 }
 0x2fd   :  { %1800 = vmatpush3.bf16.msra.mxu1 %v581_v36 }
 0x2fe   :  { %v1789_v37 = vpop.f32.mrb[28].mxu0  ;;  %1801 = vmatprep.subr.bf16.mxu1 %v582_v34 }
 0x2ff   :  { %v562_v38 = vpop.f32.mrb[29].mxu0 }
 0x300   :  { %v1790_v39 = vpop.f32.mrb[30].mxu0 }
 0x301   :  { %v584_v40 = vpack.c.bf16 %v1790_v39, %v1789_v37  ;;  %v565_v41 = vpop.f32.mrb[31].mxu0  ;;  %1802 = vmatpush3.bf16.msra.mxu1 %v582_v34 }
 0x302   :  { %v583_v42 = vpack.c.bf16 %v565_v41, %v562_v38 }
 0x304   :  { %1803 = vmatprep.subr.bf16.mxu1 %v583_v42 }
 0x305   :  { %1804 = vmatpush3.bf16.msra.mxu1 %v583_v42 }
 0x306   :  { %1805 = vmatprep.subr.bf16.mxu1 %v584_v40 }
 0x309   :  { %1806 = vmatpush3.bf16.msra.mxu1 %v584_v40 }
 0x30c   :  { %1808 = vmatmul.mubr.bf16.vlgmr.msra.gmra.mrb[16].mxu1 %v2300_v60 }
 0x30d   :  { %1811 = vmatprep.mubr.bf16.mxu1 %v2305_v61 }
 0x314   :  { %1812 = vmatmul.mubr.bf16.gmra.mrb[20].mxu1 %v2312_v62 }
 0x315   :  { %1815 = vmatprep.mubr.bf16.mxu1 %v2317_v63 }
 0x31c   :  { %1816 = vmatmul.mubr.bf16.gmra.mrb[24].mxu1 %v2324_v0 }
 0x31d   :  { %1819 = vmatprep.mubr.bf16.mxu1 %v2329_v1 }
 0x324   :  { %1820 = vmatmul.mubr.bf16.gmra.mrb[28].mxu1 %v2336_v2 }
 0x325   :  { %1871 = vmatprep.mubr.bf16.mxu1 %v2294_v32 }
 0x3df   :  { %v1809_v50 = vpop.f32.mrb[16].mxu1 }
 0x3e0   :  { %v632_v51 = vadd.f32 %v1809_v50, %v588_v49  ;;  %v623_v52 = vpop.f32.mrb[17].mxu1 }
 0x3e1   :  { %v624_v53 = vadd.f32 %v623_v52, %v588_v49  ;;  %v1810_v54 = vpop.f32.mrb[18].mxu1 }
 0x3e2   :  { %2082 = vtanh.f32 %v632_v51  ;;  %v635_v55 = vadd.f32 %v1810_v54, %v588_v49  ;;  %v626_v56 = vpop.f32.mrb[19].mxu1  ;;  %v2036_v54 = vld [vmem:[#allocation2 + $0xd0] sm:$0xff]  }
 0x3e3   :  { %2084 = vtanh.f32 %v624_v53  ;;  %v627_v57 = vadd.f32 %v626_v56, %v588_v49  ;;  %v2035_v53 = vld [vmem:[#allocation2 + $0xc8] sm:$0xff]  }
 0x3e4   :  { %2086 = vtanh.f32 %v635_v55 }
 0x3e5   :  { %2088 = vtanh.f32 %v627_v57 }
 0x3e7   :  { %v1813_v58 = vpop.f32.mrb[20].mxu1 }
 0x3e8   :  { %v648_v59 = vadd.f32 %v1813_v58, %v588_v49  ;;  %v639_v3 = vpop.f32.mrb[21].mxu1 }
 0x3e9   :  { %v640_v4 = vadd.f32 %v639_v3, %v588_v49  ;;  %v1814_v5 = vpop.f32.mrb[22].mxu1 }
 0x3ea   :  { %2090 = vtanh.f32 %v648_v59  ;;  %v651_v6 = vadd.f32 %v1814_v5, %v588_v49  ;;  %v642_v7 = vpop.f32.mrb[23].mxu1 }
 0x3eb   :  { %2092 = vtanh.f32 %v640_v4  ;;  %v643_v8 = vadd.f32 %v642_v7, %v588_v49 }
 0x3ec   :  { %v2083_v10 = vpop.eup %2082  ;;  %2094 = vtanh.f32 %v651_v6 }
 0x3ed   :  { %v2085_v13 = vpop.eup %2084  ;;  %2096 = vtanh.f32 %v643_v8 }
 0x3ee   :  { %v2087_v14 = vpop.eup %2086 }
 0x3ef   :  { %v2089_v15 = vpop.eup %2088  ;;  %v1817_v12 = vpop.f32.mrb[24].mxu1  ;;  %v703_v16 = vpack.c.bf16 %v2087_v14, %v2083_v10 }
 0x3f0   :  { %v664_v17 = vadd.f32 %v1817_v12, %v588_v49  ;;  %v655_v18 = vpop.f32.mrb[25].mxu1  ;;  %v702_v19 = vpack.c.bf16 %v2089_v15, %v2085_v13 }
 0x3f1   :  { %v656_v20 = vadd.f32 %v655_v18, %v588_v49  ;;  %v1818_v21 = vpop.f32.mrb[26].mxu1 }
 0x3f2   :  { %2098 = vtanh.f32 %v664_v17  ;;  %v667_v22 = vadd.f32 %v1818_v21, %v588_v49  ;;  %v658_v23 = vpop.f32.mrb[27].mxu1  ;;  %1839 = vmatprep.mubr.bf16.mxu0 %v702_v19 }
 0x3f3   :  { %2100 = vtanh.f32 %v656_v20  ;;  %v659_v24 = vadd.f32 %v658_v23, %v588_v49  ;;  %1840 = vmatmul.mubr.bf16.vlgmr.msra.gmra.mrb[32].mxu0 %v703_v16 }
 0x3f4   :  { %v2091_v25 = vpop.eup %2090  ;;  %2102 = vtanh.f32 %v667_v22 }
 0x3f5   :  { %v2093_v26 = vpop.eup %2092  ;;  %2104 = vtanh.f32 %v659_v24  ;;  %v2037_v24 = vld [vmem:[#allocation2 + $0xd8] sm:$0xff]  }
 0x3f6   :  { %v2095_v27 = vpop.eup %2094 }
 0x3f7   :  { %v2097_v28 = vpop.eup %2096  ;;  %v1821_v29 = vpop.f32.mrb[28].mxu1  ;;  %v705_v30 = vpack.c.bf16 %v2095_v27, %v2091_v25  ;;  %v2038_v25 = vld [vmem:[#allocation2 + $0xe0] sm:$0xff]   ;;  %v2040_v27 = vld [vmem:[#allocation2 + $0xf0] sm:$0xff]  }
 0x3f8   :  { %v680_v31 = vadd.f32 %v1821_v29, %v588_v49  ;;  %v671_v33 = vpop.f32.mrb[29].mxu1  ;;  %v704_v34 = vpack.c.bf16 %v2097_v28, %v2093_v26  ;;  %v2039_v26 = vld [vmem:[#allocation2 + $0xe8] sm:$0xff]   ;;  %v2041_v28 = vld [vmem:[#allocation2 + $0xf8] sm:$0xff]   ;;  %v882_v29 = vsub.s32 2, %v2340_v9 }
 0x3f9   :  { %v672_v35 = vadd.f32 %v671_v33, %v588_v49  ;;  %v1822_v36 = vpop.f32.mrb[30].mxu1 }
 0x3fa   :  { %2106 = vtanh.f32 %v680_v31  ;;  %v683_v37 = vadd.f32 %v1822_v36, %v588_v49  ;;  %v674_v38 = vpop.f32.mrb[31].mxu1  ;;  %1843 = vmatprep.mubr.bf16.mxu0 %v704_v34 }
 0x3fb   :  { %2108 = vtanh.f32 %v672_v35  ;;  %v675_v39 = vadd.f32 %v674_v38, %v588_v49  ;;  %1844 = vmatmul.mubr.bf16.gmra.mrb[36].mxu0 %v705_v30  ;;  %v2034_v49 = vld [vmem:[#allocation2 + $0xc0] sm:$0xff]   ;;  %v883_v30 = vrot.slane %v2346_v11, %v882_v29 }
 0x3fc   :  { %v2099_v40 = vpop.eup %2098  ;;  %2110 = vtanh.f32 %v683_v37  ;;  %1887 = vmatprep.subr.bf16.mxu0 %v2034_v49 }
 0x3fd   :  { %v2101_v41 = vpop.eup %2100  ;;  %2112 = vtanh.f32 %v675_v39  ;;  %1888 = vmatpush3.bf16.msra.mxu0 %v2034_v49 }
 0x3fe   :  { %v2103_v42 = vpop.eup %2102  ;;  %1889 = vmatprep.subr.bf16.mxu0 %v2035_v53 }
 0x3ff   :  { %v2105_v43 = vpop.eup %2104  ;;  %v707_v44 = vpack.c.bf16 %v2103_v42, %v2099_v40 }
 0x400   :  { %v706_v45 = vpack.c.bf16 %v2105_v43, %v2101_v41 }
 0x401   :  { %1890 = vmatpush3.bf16.msra.mxu0 %v2035_v53 }
 0x402   :  { %1847 = vmatprep.mubr.bf16.mxu0 %v706_v45  ;;  %1891 = vmatprep.subr.bf16.mxu0 %v2036_v54 }
 0x403   :  { %1848 = vmatmul.mubr.bf16.gmra.mrb[40].mxu0 %v707_v44 }
 0x404   :  { %v2107_v46 = vpop.eup %2106 }
 0x405   :  { %v2109_v47 = vpop.eup %2108  ;;  %1892 = vmatpush3.bf16.msra.mxu0 %v2036_v54 }
 0x406   :  { %v2111_v48 = vpop.eup %2110  ;;  %1893 = vmatprep.subr.bf16.mxu0 %v2037_v24 }
 0x407   :  { %v2113_v50 = vpop.eup %2112  ;;  %v709_v51 = vpack.c.bf16 %v2111_v48, %v2107_v46 }
 0x408   :  { %v708_v52 = vpack.c.bf16 %v2113_v50, %v2109_v47 }
 0x409   :  { %1894 = vmatpush3.bf16.msra.mxu0 %v2037_v24 }
 0x40a   :  { %1851 = vmatprep.mubr.bf16.mxu0 %v708_v52  ;;  %1895 = vmatprep.subr.bf16.mxu0 %v2038_v25 }
 0x40b   :  { %1852 = vmatmul.mubr.bf16.gmra.mrb[44].mxu0 %v709_v51 }
 0x40d   :  { %1896 = vmatpush3.bf16.msra.mxu0 %v2038_v25 }
 0x40e   :  { %1897 = vmatprep.subr.bf16.mxu0 %v2039_v26 }
 0x411   :  { %1898 = vmatpush3.bf16.msra.mxu0 %v2039_v26 }
 0x412   :  { %1899 = vmatprep.subr.bf16.mxu0 %v2040_v27 }
 0x415   :  { %1900 = vmatpush3.bf16.msra.mxu0 %v2040_v27 }
 0x416   :  { %1901 = vmatprep.subr.bf16.mxu0 %v2041_v28 }
 0x419   :  { %1902 = vmatpush3.bf16.msra.mxu0 %v2041_v28 }
 0x4c6   :  { %v1841_v55 = vpop.f32.mrb[32].mxu0 }
 0x4c7   :  { %v809_v56 = vpop.f32.mrb[33].mxu0 }
 0x4c8   :  { %v1842_v57 = vpop.f32.mrb[34].mxu0 }
 0x4c9   :  { %v873_v58 = vpack.c.bf16 %v1842_v57, %v1841_v55  ;;  %v812_v59 = vpop.f32.mrb[35].mxu0 }
 0x4ca   :  { %v872_v3 = vpack.c.bf16 %v812_v59, %v809_v56 }
 0x4cc   :  { %1855 = vmatprep.subr.bf16.mxu1 %v872_v3 }
 0x4cd   :  { %1856 = vmatpush3.bf16.msra.mxu1 %v872_v3 }
 0x4ce   :  { %v1845_v4 = vpop.f32.mrb[36].mxu0  ;;  %1857 = vmatprep.subr.bf16.mxu1 %v873_v58 }
 0x4cf   :  { %v825_v5 = vpop.f32.mrb[37].mxu0 }
 0x4d0   :  { %v1846_v6 = vpop.f32.mrb[38].mxu0 }
 0x4d1   :  { %v875_v7 = vpack.c.bf16 %v1846_v6, %v1845_v4  ;;  %v828_v8 = vpop.f32.mrb[39].mxu0  ;;  %1858 = vmatpush3.bf16.msra.mxu1 %v873_v58 }
 0x4d2   :  { %v874_v10 = vpack.c.bf16 %v828_v8, %v825_v5 }
 0x4d4   :  { %1859 = vmatprep.subr.bf16.mxu1 %v874_v10 }
 0x4d5   :  { %1860 = vmatpush3.bf16.msra.mxu1 %v874_v10 }
 0x4d6   :  { %v1849_v13 = vpop.f32.mrb[40].mxu0  ;;  %1861 = vmatprep.subr.bf16.mxu1 %v875_v7 }
 0x4d7   :  { %v841_v14 = vpop.f32.mrb[41].mxu0 }
 0x4d8   :  { %v1850_v15 = vpop.f32.mrb[42].mxu0 }
 0x4d9   :  { %v877_v12 = vpack.c.bf16 %v1850_v15, %v1849_v13  ;;  %v844_v16 = vpop.f32.mrb[43].mxu0  ;;  %1862 = vmatpush3.bf16.msra.mxu1 %v875_v7 }
 0x4da   :  { %v876_v17 = vpack.c.bf16 %v844_v16, %v841_v14 }
 0x4dc   :  { %1863 = vmatprep.subr.bf16.mxu1 %v876_v17 }
 0x4dd   :  { %1864 = vmatpush3.bf16.msra.mxu1 %v876_v17 }
 0x4de   :  { %v1853_v18 = vpop.f32.mrb[44].mxu0  ;;  %1865 = vmatprep.subr.bf16.mxu1 %v877_v12 }
 0x4df   :  { %v857_v19 = vpop.f32.mrb[45].mxu0 }
 0x4e0   :  { %v1854_v20 = vpop.f32.mrb[46].mxu0 }
 0x4e1   :  { %v879_v21 = vpack.c.bf16 %v1854_v20, %v1853_v18  ;;  %v860_v22 = vpop.f32.mrb[47].mxu0  ;;  %1866 = vmatpush3.bf16.msra.mxu1 %v877_v12 }
 0x4e2   :  { %v878_v23 = vpack.c.bf16 %v860_v22, %v857_v19 }
 0x4e4   :  { %1867 = vmatprep.subr.bf16.mxu1 %v878_v23 }
 0x4e5   :  { %1868 = vmatpush3.bf16.msra.mxu1 %v878_v23 }
 0x4e6   :  { %1869 = vmatprep.subr.bf16.mxu1 %v879_v21 }
 0x4e9   :  { %1870 = vmatpush3.bf16.msra.mxu1 %v879_v21 }
 0x4ec   :  { %1872 = vmatmul.mubr.bf16.vlgmr.msra.gmra.mrb[32].mxu1 %v2300_v60 }
 0x4ed   :  { %1875 = vmatprep.mubr.bf16.mxu1 %v2305_v61 }
 0x4f4   :  { %1876 = vmatmul.mubr.bf16.gmra.mrb[36].mxu1 %v2312_v62 }
 0x4f5   :  { %1879 = vmatprep.mubr.bf16.mxu1 %v2317_v63 }
 0x4fc   :  { %1880 = vmatmul.mubr.bf16.gmra.mrb[40].mxu1 %v2324_v0 }
 0x4fd   :  { %1883 = vmatprep.mubr.bf16.mxu1 %v2329_v1 }
 0x504   :  { %1884 = vmatmul.mubr.bf16.gmra.mrb[44].mxu1 %v2336_v2 }
 0x505   :  { %1935 = vmatprep.mubr.bf16.mxu1 %v2294_v32 }
 0x5bf   :  { %v1873_v32 = vpop.f32.mrb[32].mxu1 }
 0x5c0   :  { %v927_v31 = vadd.f32 %v1873_v32, %v883_v30  ;;  %v918_v33 = vpop.f32.mrb[33].mxu1 }
 0x5c1   :  { %v919_v34 = vadd.f32 %v918_v33, %v883_v30  ;;  %v1874_v35 = vpop.f32.mrb[34].mxu1  ;;  %v2043_v33 = vld [vmem:[#allocation2 + $0x108] sm:$0xff]  }
 0x5c2   :  { %2114 = vtanh.f32 %v927_v31  ;;  %v930_v36 = vadd.f32 %v1874_v35, %v883_v30  ;;  %v921_v37 = vpop.f32.mrb[35].mxu1 }
 0x5c3   :  { %2116 = vtanh.f32 %v919_v34  ;;  %v922_v38 = vadd.f32 %v921_v37, %v883_v30  ;;  %v2044_v34 = vld [vmem:[#allocation2 + $0x110] sm:$0xff]  }
 0x5c4   :  { %2118 = vtanh.f32 %v930_v36 }
 0x5c5   :  { %2120 = vtanh.f32 %v922_v38 }
 0x5c7   :  { %v1877_v39 = vpop.f32.mrb[36].mxu1 }
 0x5c8   :  { %v943_v40 = vadd.f32 %v1877_v39, %v883_v30  ;;  %v934_v41 = vpop.f32.mrb[37].mxu1 }
 0x5c9   :  { %v935_v42 = vadd.f32 %v934_v41, %v883_v30  ;;  %v1878_v43 = vpop.f32.mrb[38].mxu1 }
 0x5ca   :  { %2122 = vtanh.f32 %v943_v40  ;;  %v946_v44 = vadd.f32 %v1878_v43, %v883_v30  ;;  %v937_v45 = vpop.f32.mrb[39].mxu1 }
 0x5cb   :  { %2124 = vtanh.f32 %v935_v42  ;;  %v938_v46 = vadd.f32 %v937_v45, %v883_v30 }
 0x5cc   :  { %v2115_v47 = vpop.eup %2114  ;;  %2126 = vtanh.f32 %v946_v44 }
 0x5cd   :  { %v2117_v48 = vpop.eup %2116  ;;  %2128 = vtanh.f32 %v938_v46 }
 0x5ce   :  { %v2119_v50 = vpop.eup %2118 }
 0x5cf   :  { %v2121_v51 = vpop.eup %2120  ;;  %v1881_v52 = vpop.f32.mrb[40].mxu1  ;;  %v998_v49 = vpack.c.bf16 %v2119_v50, %v2115_v47 }
 0x5d0   :  { %v959_v53 = vadd.f32 %v1881_v52, %v883_v30  ;;  %v950_v54 = vpop.f32.mrb[41].mxu1  ;;  %v997_v55 = vpack.c.bf16 %v2121_v51, %v2117_v48 }
 0x5d1   :  { %v951_v56 = vadd.f32 %v950_v54, %v883_v30  ;;  %v1882_v57 = vpop.f32.mrb[42].mxu1 }
 0x5d2   :  { %2130 = vtanh.f32 %v959_v53  ;;  %v962_v58 = vadd.f32 %v1882_v57, %v883_v30  ;;  %v953_v59 = vpop.f32.mrb[43].mxu1  ;;  %1903 = vmatprep.mubr.bf16.mxu0 %v997_v55 }
 0x5d3   :  { %2132 = vtanh.f32 %v951_v56  ;;  %v954_v3 = vadd.f32 %v953_v59, %v883_v30  ;;  %1904 = vmatmul.mubr.bf16.vlgmr.msra.gmra.mrb[48].mxu0 %v998_v49  ;;  %v2045_v59 = vld [vmem:[#allocation2 + $0x118] sm:$0xff]  }
 0x5d4   :  { %v2123_v4 = vpop.eup %2122  ;;  %2134 = vtanh.f32 %v962_v58 }
 0x5d5   :  { %v2125_v5 = vpop.eup %2124  ;;  %2136 = vtanh.f32 %v954_v3 }
 0x5d6   :  { %v2127_v6 = vpop.eup %2126 }
 0x5d7   :  { %v2129_v7 = vpop.eup %2128  ;;  %v1885_v8 = vpop.f32.mrb[44].mxu1  ;;  %v1000_v10 = vpack.c.bf16 %v2127_v6, %v2123_v4 }
 0x5d8   :  { %v975_v13 = vadd.f32 %v1885_v8, %v883_v30  ;;  %v966_v14 = vpop.f32.mrb[45].mxu1  ;;  %v999_v15 = vpack.c.bf16 %v2129_v7, %v2125_v5 }
 0x5d9   :  { %v967_v12 = vadd.f32 %v966_v14, %v883_v30  ;;  %v1886_v16 = vpop.f32.mrb[46].mxu1 }
 0x5da   :  { %2138 = vtanh.f32 %v975_v13  ;;  %v978_v17 = vadd.f32 %v1886_v16, %v883_v30  ;;  %v969_v18 = vpop.f32.mrb[47].mxu1  ;;  %1907 = vmatprep.mubr.bf16.mxu0 %v999_v15 }
 0x5db   :  { %2140 = vtanh.f32 %v967_v12  ;;  %v970_v19 = vadd.f32 %v969_v18, %v883_v30  ;;  %1908 = vmatmul.mubr.bf16.gmra.mrb[52].mxu0 %v1000_v10  ;;  %v2042_v30 = vld [vmem:[#allocation2 + $0x100] sm:$0xff]  }
 0x5dc   :  { %v2131_v20 = vpop.eup %2130  ;;  %2142 = vtanh.f32 %v978_v17  ;;  %1951 = vmatprep.subr.bf16.mxu0 %v2042_v30 }
 0x5dd   :  { %v2133_v21 = vpop.eup %2132  ;;  %2144 = vtanh.f32 %v970_v19  ;;  %1952 = vmatpush3.bf16.msra.mxu0 %v2042_v30 }
 0x5de   :  { %v2135_v22 = vpop.eup %2134  ;;  %1953 = vmatprep.subr.bf16.mxu0 %v2043_v33 }
 0x5df   :  { %v2137_v23 = vpop.eup %2136  ;;  %v1002_v24 = vpack.c.bf16 %v2135_v22, %v2131_v20 }
 0x5e0   :  { %v1001_v25 = vpack.c.bf16 %v2137_v23, %v2133_v21 }
 0x5e1   :  { %1954 = vmatpush3.bf16.msra.mxu0 %v2043_v33 }
 0x5e2   :  { %1911 = vmatprep.mubr.bf16.mxu0 %v1001_v25  ;;  %1955 = vmatprep.subr.bf16.mxu0 %v2044_v34 }
 0x5e3   :  { %1912 = vmatmul.mubr.bf16.gmra.mrb[56].mxu0 %v1002_v24 }
 0x5e4   :  { %v2139_v26 = vpop.eup %2138 }
 0x5e5   :  { %v2141_v27 = vpop.eup %2140  ;;  %1956 = vmatpush3.bf16.msra.mxu0 %v2044_v34 }
 0x5e6   :  { %v2143_v28 = vpop.eup %2142  ;;  %1957 = vmatprep.subr.bf16.mxu0 %v2045_v59 }
 0x5e7   :  { %v2145_v29 = vpop.eup %2144  ;;  %v1004_v32 = vpack.c.bf16 %v2143_v28, %v2139_v26 }
 0x5e8   :  { %v1003_v31 = vpack.c.bf16 %v2145_v29, %v2141_v27 }
 0x5e9   :  { %1958 = vmatpush3.bf16.msra.mxu0 %v2045_v59 }
 0x5ea   :  { %1915 = vmatprep.mubr.bf16.mxu0 %v1003_v31 }
 0x5eb   :  { %1916 = vmatmul.mubr.bf16.gmra.mrb[60].mxu0 %v1004_v32 }
 0x6a6   :  { %v1905_v35 = vpop.f32.mrb[48].mxu0 }
 0x6a7   :  { %v1104_v36 = vpop.f32.mrb[49].mxu0 }
 0x6a8   :  { %v1906_v37 = vpop.f32.mrb[50].mxu0 }
 0x6a9   :  { %v1168_v38 = vpack.c.bf16 %v1906_v37, %v1905_v35  ;;  %v1107_v39 = vpop.f32.mrb[51].mxu0 }
 0x6aa   :  { %v1167_v40 = vpack.c.bf16 %v1107_v39, %v1104_v36 }
 0x6ac   :  { %1919 = vmatprep.subr.bf16.mxu1 %v1167_v40 }
 0x6ad   :  { %1920 = vmatpush3.bf16.msra.mxu1 %v1167_v40 }
 0x6ae   :  { %v1909_v41 = vpop.f32.mrb[52].mxu0  ;;  %1921 = vmatprep.subr.bf16.mxu1 %v1168_v38 }
 0x6af   :  { %v1120_v42 = vpop.f32.mrb[53].mxu0 }
 0x6b0   :  { %v1910_v43 = vpop.f32.mrb[54].mxu0 }
 0x6b1   :  { %v1170_v44 = vpack.c.bf16 %v1910_v43, %v1909_v41  ;;  %v1123_v45 = vpop.f32.mrb[55].mxu0  ;;  %1922 = vmatpush3.bf16.msra.mxu1 %v1168_v38 }
 0x6b2   :  { %v1169_v46 = vpack.c.bf16 %v1123_v45, %v1120_v42 }
 0x6b4   :  { %1923 = vmatprep.subr.bf16.mxu1 %v1169_v46 }
 0x6b5   :  { %1924 = vmatpush3.bf16.msra.mxu1 %v1169_v46 }
 0x6b6   :  { %v1913_v47 = vpop.f32.mrb[56].mxu0  ;;  %1925 = vmatprep.subr.bf16.mxu1 %v1170_v44 }
 0x6b7   :  { %v1136_v48 = vpop.f32.mrb[57].mxu0 }
 0x6b8   :  { %v1914_v50 = vpop.f32.mrb[58].mxu0 }
 0x6b9   :  { %v1172_v51 = vpack.c.bf16 %v1914_v50, %v1913_v47  ;;  %v1139_v52 = vpop.f32.mrb[59].mxu0  ;;  %1926 = vmatpush3.bf16.msra.mxu1 %v1170_v44 }
 0x6ba   :  { %v1171_v49 = vpack.c.bf16 %v1139_v52, %v1136_v48 }
 0x6bc   :  { %1927 = vmatprep.subr.bf16.mxu1 %v1171_v49 }
 0x6bd   :  { %1928 = vmatpush3.bf16.msra.mxu1 %v1171_v49 }
 0x6be   :  { %v1917_v53 = vpop.f32.mrb[60].mxu0  ;;  %1929 = vmatprep.subr.bf16.mxu1 %v1172_v51 }
 0x6bf   :  { %v1152_v54 = vpop.f32.mrb[61].mxu0 }
 0x6c0   :  { %v1918_v55 = vpop.f32.mrb[62].mxu0 }
 0x6c1   :  { %v1174_v56 = vpack.c.bf16 %v1918_v55, %v1917_v53  ;;  %v1155_v57 = vpop.f32.mrb[63].mxu0  ;;  %1930 = vmatpush3.bf16.msra.mxu1 %v1172_v51 }
 0x6c2   :  { %v1173_v58 = vpack.c.bf16 %v1155_v57, %v1152_v54 }
 0x6c4   :  { %1931 = vmatprep.subr.bf16.mxu1 %v1173_v58 }
 0x6c5   :  { %1932 = vmatpush3.bf16.msra.mxu1 %v1173_v58 }
 0x6c6   :  { %1933 = vmatprep.subr.bf16.mxu1 %v1174_v56 }
 0x6c9   :  { %1934 = vmatpush3.bf16.msra.mxu1 %v1174_v56 }
 0x6ca   :  { %1983 = vmatprep.subr.bf16.mxu1 %v2042_v30 }
 0x6cc   :  { %1936 = vmatmul.mubr.bf16.vlgmr.msra.gmra.mrb[48].mxu1 %v2300_v60  ;;  %v2046_v60 = vld [vmem:[#allocation2 + $0x120] sm:$0xff]  }
 0x6cd   :  { %1939 = vmatprep.mubr.bf16.mxu1 %v2305_v61  ;;  %1991 = vmatpush3.bf16.msra.mxu1 %v2042_v30  ;;  %v2047_v61 = vld [vmem:[#allocation2 + $0x128] sm:$0xff]  }
 0x6ce   :  { %1984 = vmatprep.subr.bf16.mxu1 %v2043_v33  ;;  %1959 = vmatprep.subr.bf16.mxu0 %v2046_v60 }
 0x6cf   :  { %1960 = vmatpush3.bf16.msra.mxu0 %v2046_v60 }
 0x6d0   :  { %1961 = vmatprep.subr.bf16.mxu0 %v2047_v61 }
 0x6d1   :  { %1992 = vmatpush3.bf16.msra.mxu1 %v2043_v33 }
 0x6d2   :  { %1985 = vmatprep.subr.bf16.mxu1 %v2044_v34 }
 0x6d3   :  { %1962 = vmatpush3.bf16.msra.mxu0 %v2047_v61 }
 0x6d4   :  { %1940 = vmatmul.mubr.bf16.gmra.mrb[52].mxu1 %v2312_v62  ;;  %v2048_v62 = vld [vmem:[#allocation2 + $0x130] sm:$0xff]  }
 0x6d5   :  { %1943 = vmatprep.mubr.bf16.mxu1 %v2317_v63  ;;  %1993 = vmatpush3.bf16.msra.mxu1 %v2044_v34  ;;  %v2049_v63 = vld [vmem:[#allocation2 + $0x138] sm:$0xff]  }
 0x6d6   :  { %1986 = vmatprep.subr.bf16.mxu1 %v2045_v59  ;;  %1963 = vmatprep.subr.bf16.mxu0 %v2048_v62 }
 0x6d7   :  { %1964 = vmatpush3.bf16.msra.mxu0 %v2048_v62 }
 0x6d8   :  { %1965 = vmatprep.subr.bf16.mxu0 %v2049_v63 }
 0x6d9   :  { %1994 = vmatpush3.bf16.msra.mxu1 %v2045_v59  ;;  %v1319_v59 = vsub.s32 4, %v2340_v9 }
 0x6da   :  { %1987 = vmatprep.subr.bf16.mxu1 %v2046_v60 }
 0x6db   :  { %1966 = vmatpush3.bf16.msra.mxu0 %v2049_v63 }
 0x6dc   :  { %1944 = vmatmul.mubr.bf16.gmra.mrb[56].mxu1 %v2324_v0  ;;  %v1177_v0 = vsub.s32 3, %v2340_v9 }
 0x6dd   :  { %1947 = vmatprep.mubr.bf16.mxu1 %v2329_v1  ;;  %1995 = vmatpush3.bf16.msra.mxu1 %v2046_v60  ;;  %v2178_v60 = vld [vmem:[%s2469_s3] sm:$0xff] }
 0x6de   :  { %1988 = vmatprep.subr.bf16.mxu1 %v2047_v61  ;;  %v1178_v1 = vrot.slane %v2346_v11, %v1177_v0 }
 0x6e1   :  { %1996 = vmatpush3.bf16.msra.mxu1 %v2047_v61  ;;  %v1320_v61 = vrot.slane %v2178_v60, %v1319_v59 }
 0x6e2   :  { %1989 = vmatprep.subr.bf16.mxu1 %v2048_v62 }
 0x6e4   :  { %1948 = vmatmul.mubr.bf16.gmra.mrb[60].mxu1 %v2336_v2 }
 0x6e5   :  { %1997 = vmatpush3.bf16.msra.mxu1 %v2048_v62 }
 0x6e6   :  { %1990 = vmatprep.subr.bf16.mxu1 %v2049_v63 }
 0x6e9   :  { %1998 = vmatpush3.bf16.msra.mxu1 %v2049_v63 }
 0x79f   :  { %v1937_v2 = vpop.f32.mrb[48].mxu1 }
 0x7a0   :  { %v1213_v3 = vpop.f32.mrb[49].mxu1  ;;  %v1222_v6 = vadd.f32 %v1937_v2, %v1178_v1 }
 0x7a1   :  { %v1214_v4 = vadd.f32 %v1213_v3, %v1178_v1  ;;  %v1938_v5 = vpop.f32.mrb[50].mxu1 }
 0x7a2   :  { %v1225_v7 = vadd.f32 %v1938_v5, %v1178_v1  ;;  %v1216_v8 = vpop.f32.mrb[51].mxu1 }
 0x7a3   :  { %2146 = vtanh.f32 %v1214_v4  ;;  %v1217_v10 = vadd.f32 %v1216_v8, %v1178_v1 }
 0x7a4   :  { %2148 = vtanh.f32 %v1225_v7 }
 0x7a5   :  { %2150 = vtanh.f32 %v1217_v10 }
 0x7a6   :  { %2152 = vtanh.f32 %v1222_v6 }
 0x7a7   :  { %v1941_v13 = vpop.f32.mrb[52].mxu1 }
 0x7a8   :  { %v1229_v14 = vpop.f32.mrb[53].mxu1  ;;  %v1238_v16 = vadd.f32 %v1941_v13, %v1178_v1 }
 0x7a9   :  { %v1230_v15 = vadd.f32 %v1229_v14, %v1178_v1  ;;  %v1942_v12 = vpop.f32.mrb[54].mxu1 }
 0x7aa   :  { %v1241_v17 = vadd.f32 %v1942_v12, %v1178_v1  ;;  %v1232_v18 = vpop.f32.mrb[55].mxu1 }
 0x7ab   :  { %2154 = vtanh.f32 %v1230_v15  ;;  %v1233_v11 = vadd.f32 %v1232_v18, %v1178_v1 }
 0x7ac   :  { %2156 = vtanh.f32 %v1241_v17 }
 0x7ad   :  { %v2378_v19 = vpop.eup %2146  ;;  %2158 = vtanh.f32 %v1233_v11 }
 0x7ae   :  { %v2380_v20 = vpop.eup %2148  ;;  %2160 = vtanh.f32 %v1238_v16 }
 0x7af   :  { %v2382_v21 = vpop.eup %2150  ;;  %v1945_v22 = vpop.f32.mrb[56].mxu1 }
 0x7b0   :  { %v2153_v23 = vpop.eup %2152  ;;  %v1245_v24 = vpop.f32.mrb[57].mxu1  ;;  %v1292_v25 = vpack.c.bf16 %v2382_v21, %v2378_v19  ;;  %v1254_v29 = vadd.f32 %v1945_v22, %v1178_v1 }
 0x7b1   :  { %v1246_v26 = vadd.f32 %v1245_v24, %v1178_v1  ;;  %v1946_v27 = vpop.f32.mrb[58].mxu1  ;;  %v1293_v28 = vpack.c.bf16 %v2380_v20, %v2153_v23 }
 0x7b2   :  { %v1257_v32 = vadd.f32 %v1946_v27, %v1178_v1  ;;  %v1248_v31 = vpop.f32.mrb[59].mxu1  ;;  %1967 = vmatprep.mubr.bf16.mxu0 %v1292_v25 }
 0x7b3   :  { %2162 = vtanh.f32 %v1246_v26  ;;  %v1249_v30 = vadd.f32 %v1248_v31, %v1178_v1  ;;  %1968 = vmatmul.mubr.bf16.vlgmr.msra.gmra.mrb[64].mxu0 %v1293_v28 }
 0x7b4   :  { %2164 = vtanh.f32 %v1257_v32 }
 0x7b5   :  { %v2387_v33 = vpop.eup %2154  ;;  %2166 = vtanh.f32 %v1249_v30 }
 0x7b6   :  { %v2389_v34 = vpop.eup %2156  ;;  %2168 = vtanh.f32 %v1254_v29 }
 0x7b7   :  { %v2391_v35 = vpop.eup %2158  ;;  %v1949_v36 = vpop.f32.mrb[60].mxu1 }
 0x7b8   :  { %v2161_v37 = vpop.eup %2160  ;;  %v1261_v38 = vpop.f32.mrb[61].mxu1  ;;  %v1294_v39 = vpack.c.bf16 %v2391_v35, %v2387_v33  ;;  %v1270_v43 = vadd.f32 %v1949_v36, %v1178_v1 }
 0x7b9   :  { %v1262_v40 = vadd.f32 %v1261_v38, %v1178_v1  ;;  %v1950_v41 = vpop.f32.mrb[62].mxu1  ;;  %v1295_v42 = vpack.c.bf16 %v2389_v34, %v2161_v37 }
 0x7ba   :  { %v1273_v44 = vadd.f32 %v1950_v41, %v1178_v1  ;;  %v1264_v45 = vpop.f32.mrb[63].mxu1  ;;  %1971 = vmatprep.mubr.bf16.mxu0 %v1294_v39 }
 0x7bb   :  { %2170 = vtanh.f32 %v1262_v40  ;;  %v1265_v46 = vadd.f32 %v1264_v45, %v1178_v1  ;;  %1972 = vmatmul.mubr.bf16.gmra.mrb[68].mxu0 %v1295_v42 }
 0x7bc   :  { %2172 = vtanh.f32 %v1273_v44 }
 0x7bd   :  { %v2163_v47 = vpop.eup %2162  ;;  %2174 = vtanh.f32 %v1265_v46 }
 0x7be   :  { %v2165_v48 = vpop.eup %2164  ;;  %2176 = vtanh.f32 %v1270_v43 }
 0x7bf   :  { %v2167_v50 = vpop.eup %2166 }
 0x7c0   :  { %v2169_v51 = vpop.eup %2168  ;;  %v1296_v52 = vpack.c.bf16 %v2167_v50, %v2163_v47 }
 0x7c1   :  { %v1297_v49 = vpack.c.bf16 %v2165_v48, %v2169_v51 }
 0x7c2   :  { %1975 = vmatprep.mubr.bf16.mxu1 %v1296_v52 }
 0x7c3   :  { %1976 = vmatmul.mubr.bf16.vlgmr.msra.gmra.mrb[64].mxu1 %v1297_v49 }
 0x7c5   :  { %v2396_v53 = vpop.eup %2170 }
 0x7c6   :  { %v2398_v54 = vpop.eup %2172 }
 0x7c7   :  { %v2400_v55 = vpop.eup %2174 }
 0x7c8   :  { %v2177_v56 = vpop.eup %2176  ;;  %v1298_v57 = vpack.c.bf16 %v2400_v55, %v2396_v53 }
 0x7c9   :  { %v1299_v58 = vpack.c.bf16 %v2398_v54, %v2177_v56 }
 0x7ca   :  { %1979 = vmatprep.mubr.bf16.mxu1 %v1298_v57 }
 0x7cb   :  { %1980 = vmatmul.mubr.bf16.gmra.mrb[68].mxu1 %v1299_v58 }
 0x886   :  { %v1969_v62 = vpop.f32.mrb[64].mxu0 }
 0x887   :  { %v1412_v63 = vadd.f32 %v1969_v62, %v1320_v61  ;;  %v1403_v0 = vpop.f32.mrb[65].mxu0 }
 0x888   :  { %v1404_v1 = vadd.f32 %v1403_v0, %v1320_v61  ;;  %v1970_v2 = vpop.f32.mrb[66].mxu0 }
 0x889   :  { %v1468_v3 = vadd.f32 %v2153_v23, %v1412_v63  ;;  %v1415_v4 = vadd.f32 %v1970_v2, %v1320_v61  ;;  %v1406_v5 = vpop.f32.mrb[67].mxu0 }
 0x88a   :  { %v1466_v6 = vadd.f32 %v2378_v19, %v1404_v1  ;;  %v1407_v7 = vadd.f32 %v1406_v5, %v1320_v61 }
 0x88b   :  { %1484 = vst [vmem:[%s2470_s4 + $0x10] sm:$0xff] %v1468_v3  ;;  %v1469_v9 = vadd.f32 %v2380_v20, %v1415_v4 }
 0x88c   :  { %1482 = vst [vmem:[%s2470_s4] sm:$0xff] %v1466_v6  ;;  %v1467_v8 = vadd.f32 %v2382_v21, %v1407_v7 }
 0x88d   :  { %1485 = vst [vmem:[%s2470_s4 + $0x18] sm:$0xff] %v1469_v9 }
 0x88e   :  { %1483 = vst [vmem:[%s2470_s4 + $0x8] sm:$0xff] %v1467_v8  ;;  %v1973_v10 = vpop.f32.mrb[68].mxu0 }
 0x88f   :  { %v1428_v13 = vadd.f32 %v1973_v10, %v1320_v61  ;;  %v1419_v14 = vpop.f32.mrb[69].mxu0 }
 0x890   :  { %v1420_v15 = vadd.f32 %v1419_v14, %v1320_v61  ;;  %v1974_v12 = vpop.f32.mrb[70].mxu0 }
 0x891   :  { %v1472_v16 = vadd.f32 %v2161_v37, %v1428_v13  ;;  %v1431_v17 = vadd.f32 %v1974_v12, %v1320_v61  ;;  %v1422_v18 = vpop.f32.mrb[71].mxu0 }
 0x892   :  { %v1470_v11 = vadd.f32 %v2387_v33, %v1420_v15  ;;  %v1423_v19 = vadd.f32 %v1422_v18, %v1320_v61 }
 0x893   :  { %1488 = vst [vmem:[%s2470_s4 + $0x30] sm:$0xff] %v1472_v16  ;;  %v1473_v20 = vadd.f32 %v2389_v34, %v1431_v17 }
 0x894   :  { %1486 = vst [vmem:[%s2470_s4 + $0x20] sm:$0xff] %v1470_v11  ;;  %v1471_v21 = vadd.f32 %v2391_v35, %v1423_v19 }
 0x895   :  { %1489 = vst [vmem:[%s2470_s4 + $0x38] sm:$0xff] %v1473_v20 }
 0x896   :  { %1487 = vst [vmem:[%s2470_s4 + $0x28] sm:$0xff] %v1471_v21  ;;  %v1977_v22 = vpop.f32.mrb[64].mxu1 }
 0x897   :  { %v1444_v23 = vadd.f32 %v1977_v22, %v1320_v61  ;;  %v1435_v24 = vpop.f32.mrb[65].mxu1 }
 0x898   :  { %v1436_v25 = vadd.f32 %v1435_v24, %v1320_v61  ;;  %v1978_v26 = vpop.f32.mrb[66].mxu1 }
 0x899   :  { %v1476_v27 = vadd.f32 %v2169_v51, %v1444_v23  ;;  %v1447_v28 = vadd.f32 %v1978_v26, %v1320_v61  ;;  %v1438_v29 = vpop.f32.mrb[67].mxu1 }
 0x89a   :  { %v1474_v32 = vadd.f32 %v2163_v47, %v1436_v25  ;;  %v1439_v31 = vadd.f32 %v1438_v29, %v1320_v61 }
 0x89b   :  { %1492 = vst [vmem:[%s2470_s4 + $0x50] sm:$0xff] %v1476_v27  ;;  %v1477_v30 = vadd.f32 %v2165_v48, %v1447_v28 }
 0x89c   :  { %1490 = vst [vmem:[%s2470_s4 + $0x40] sm:$0xff] %v1474_v32  ;;  %v1475_v33 = vadd.f32 %v2167_v50, %v1439_v31 }
 0x89d   :  { %1493 = vst [vmem:[%s2470_s4 + $0x58] sm:$0xff] %v1477_v30 }
 0x89e   :  { %1491 = vst [vmem:[%s2470_s4 + $0x48] sm:$0xff] %v1475_v33  ;;  %v1981_v34 = vpop.f32.mrb[68].mxu1 }
 0x89f   :  { %v1460_v35 = vadd.f32 %v1981_v34, %v1320_v61  ;;  %v1451_v36 = vpop.f32.mrb[69].mxu1 }
 0x8a0   :  { %v1452_v37 = vadd.f32 %v1451_v36, %v1320_v61  ;;  %v1982_v38 = vpop.f32.mrb[70].mxu1 }
 0x8a1   :  { %v1480_v39 = vadd.f32 %v2177_v56, %v1460_v35  ;;  %v1463_v40 = vadd.f32 %v1982_v38, %v1320_v61  ;;  %v1454_v41 = vpop.f32.mrb[71].mxu1 }
 0x8a2   :  { %v1478_v42 = vadd.f32 %v2396_v53, %v1452_v37  ;;  %v1455_v43 = vadd.f32 %v1454_v41, %v1320_v61 }
 0x8a3   :  { %1496 = vst [vmem:[%s2470_s4 + $0x70] sm:$0xff] %v1480_v39  ;;  %v1481_v44 = vadd.f32 %v2398_v54, %v1463_v40 }
 0x8a4   :  { %1494 = vst [vmem:[%s2470_s4 + $0x60] sm:$0xff] %v1478_v42  ;;  %v1479_v45 = vadd.f32 %v2400_v55, %v1455_v43 }
 0x8a5   :  { %1497 = vst [vmem:[%s2470_s4 + $0x78] sm:$0xff] %v1481_v44 }
 0x8a6   :  { %1495 = vst [vmem:[%s2470_s4 + $0x68] sm:$0xff] %v1479_v45 }
 0x8a7   :  { %1502 = vsyncpa [#allocation3], 1 }

</bundles_post_ra>
